<compile_context>
chip_gen: v6e
topology: v6e:2x2x1
jax: 0.10.0
libtpu: 0.0.40
codegen_flags: <defaults>
</compile_context>

<pallas_src>
import jax
import jax.numpy as jnp
from jax.experimental import pallas as pl
from jax.experimental.pallas import tpu as pltpu


def _round_up(x, m):
    return ((x + m - 1) // m) * m


def _sublane_multiple(dtype):
    """Second-minor alignment for a dtype under the (8,128) / packing rules."""
    return max(8, 32 // jnp.dtype(dtype).itemsize)


def gan_generator_kernel(z_ref, p1_ref, p2_ref, o_ref):
    """One batch tile: tanh(relu(z @ W1 + b1) @ W2 + b2), fully VMEM resident.

    p1 = [W1; b1]  shape (latent_dim + 1, hidden)   (bias packed as last row)
    p2 = [W2; b2]  shape (hidden + 1, output_dim)
    """
    dz = p1_ref.shape[0] - 1       # latent_dim
    hid = p2_ref.shape[0] - 1      # hidden (= 32)

    z = z_ref[...]                                                # (bm, dz)
    w1 = p1_ref[:dz, :]                                           # (dz, hid)  static slice
    b1 = p1_ref[dz:, :].astype(jnp.float32)                       # (1, hid)
    h = jnp.dot(z, w1, preferred_element_type=jnp.float32) + b1   # MXU + VPU (f32)
    h = jnp.maximum(h, 0.0)                                       # ReLU (VPU, f32)

    w2 = p2_ref[:hid, :]                                          # (hid, out)
    b2 = p2_ref[hid:, :].astype(jnp.float32)                      # (1, out)
    y = jnp.dot(h.astype(w2.dtype), w2,
                preferred_element_type=jnp.float32) + b2          # MXU + VPU (f32)
    # Epilogue stays f32 (v5e has no bf16 VPU/EUP); cast only at the store.
    o_ref[...] = jnp.tanh(y).astype(o_ref.dtype)                  # Tanh (EUP)


def gan_generator_forward(z, w1, b1, w2, b2, *, bm=None, max_bm=4096,
                          compute_dtype=None, out_dtype=None):
    """z: (B, latent_dim) -> (B, output_dim), matching the PyTorch module.

    Weights are stored as (in_features, out_features): y = x @ W + b, which is
    equivalent to PyTorch's x @ W.T with W of shape (out_features, in_features).
    """
    B, latent_dim = z.shape
    hidden = w1.shape[1]
    output_dim = w2.shape[1]
    if compute_dtype is None:
        compute_dtype = z.dtype
    if out_dtype is None:
        out_dtype = z.dtype

    # ---- batch tiling -------------------------------------------------------
    align = max(_sublane_multiple(compute_dtype), _sublane_multiple(out_dtype))
    if bm is None:
        # ~max_bm rows per step (>= ~1 MiB of output DMA at out_dim=64, f32) for
        # large batches; otherwise aim for ~8 grid steps (DMA/compute overlap and
        # the 2-TC split on v7x), floored at 256 rows so per-step DMA stays well
        # above the fixed ~0.35 us grid-step overhead.
        bm = min(max_bm, max(256, pl.cdiv(B, 8)))
    bm = max(align, _round_up(min(bm, _round_up(B, align)), align))
    n_tiles = pl.cdiv(B, bm)
    # No jnp.pad of z: the ragged last block (if any) is handled by Pallas with
    # clipped reads and a masked writeback.

    zc = z.astype(compute_dtype)
    # Pack each bias as one extra row of its weight matrix -> 3 DMA streams.
    p1 = jnp.concatenate([w1, b1[None, :]], axis=0).astype(compute_dtype)
    p2 = jnp.concatenate([w2, b2[None, :]], axis=0).astype(compute_dtype)

    # Rough double-buffered VMEM working set (lane-padded to 128, sublane to 8).
    cbytes = jnp.dtype(compute_dtype).itemsize
    obytes = jnp.dtype(out_dtype).itemsize
    vmem_est = 2 * (
        bm * _round_up(latent_dim, 128) * cbytes
        + bm * _round_up(output_dim, 128) * obytes
        + _round_up(latent_dim + 1, 8) * _round_up(hidden, 128) * cbytes
        + _round_up(hidden + 1, 8) * _round_up(output_dim, 128) * cbytes)
    vmem_limit = None
    if vmem_est > (12 << 20):
        # Bigger-than-default tiles: raise the scoped-VMEM cap (v5e default is
        # 16 MiB) but stay under v7x's 32 MiB scoped / 64 MiB physical budget.
        vmem_limit = int(min(vmem_est + (2 << 20), 28 << 20))

    flops = 2 * B * (latent_dim * hidden + hidden * output_dim)
    bytes_accessed = (B * latent_dim * cbytes + B * output_dim * obytes
                      + p1.size * cbytes + p2.size * cbytes)

    return pl.pallas_call(
        gan_generator_kernel,
        out_shape=jax.ShapeDtypeStruct((B, output_dim), out_dtype),
        grid_spec=pltpu.PrefetchScalarGridSpec(
            num_scalar_prefetch=0,
            grid=(n_tiles,),
            in_specs=[
                pl.BlockSpec((bm, latent_dim), lambda i: (i, 0)),           # z tile
                pl.BlockSpec((latent_dim + 1, hidden), lambda i: (0, 0)),   # [W1; b1]
                pl.BlockSpec((hidden + 1, output_dim), lambda i: (0, 0)),   # [W2; b2]
            ],
            out_specs=pl.BlockSpec((bm, output_dim), lambda i: (i, 0)),     # no lane pad
        ),
        compiler_params=pltpu.CompilerParams(
            dimension_semantics=("parallel",),
            vmem_limit_bytes=vmem_limit),
        cost_estimate=pl.CostEstimate(
            flops=flops,
            transcendentals=B * output_dim,
            bytes_accessed=bytes_accessed),
    )(zc, p1, p2)


def reference_forward(z, w1, b1, w2, b2):
    h = jnp.maximum(z @ w1 + b1, 0.0)
    return jnp.tanh(h @ w2 + b2)


if __name__ == "__main__":
    latent_dim = 16
    hidden = 32          # fixed by the module definition (nn.Linear(latent_dim, 32))
    output_dim = 64

    key = jax.random.PRNGKey(0)
    k1, k2, k3, k4, kz = jax.random.split(key, 5)

    # Deterministic parameter init (PyTorch-Linear-style uniform bounds).
    lim1 = 1.0 / (latent_dim ** 0.5)
    lim2 = 1.0 / (hidden ** 0.5)
    w1 = jax.random.uniform(k1, (latent_dim, hidden), jnp.float32, -lim1, lim1)
    b1 = jax.random.uniform(k2, (hidden,), jnp.float32, -lim1, lim1)
    w2 = jax.random.uniform(k3, (hidden, output_dim), jnp.float32, -lim2, lim2)
    b2 = jax.random.uniform(k4, (output_dim,), jnp.float32, -lim2, lim2)

    # Cover: tiny batch (single partial block), ragged batch, and a batch large
    # enough for a multi-step "parallel" grid (8 tiles of 256 rows).
    for batch in (2, 10, 2048):
        kz, kb = jax.random.split(kz)
        z = jax.random.normal(kb, (batch, latent_dim), dtype=jnp.float32)

        out = jax.block_until_ready(gan_generator_forward(z, w1, b1, w2, b2))
        ref = reference_forward(z, w1, b1, w2, b2)

        assert out.shape == (batch, output_dim), out.shape
        assert out.dtype == z.dtype, out.dtype
        assert jnp.allclose(out, ref, atol=1e-5, rtol=1e-5), (
            f"mismatch at batch={batch}: "
            f"max abs err {float(jnp.max(jnp.abs(out - ref)))}")

    print("KERNEL_OK")
</pallas_src>

<mosaic_0001>
module attributes {stable_mosaic.version = 11 : i64} {
  func.func @gan_generator_kernel(%arg0: i32, %arg1: memref<8x16xf32, #tpu.memory_space<vmem>>, %arg2: memref<17x32xf32, #tpu.memory_space<vmem>>, %arg3: memref<33x64xf32, #tpu.memory_space<vmem>>, %arg4: memref<8x64xf32, #tpu.memory_space<vmem>>) attributes {dimension_semantics = [#tpu.dimension_semantics<parallel>], iteration_bounds = array<i64: 1>, scalar_prefetch = 0 : i64, scratch_operands = 0 : i64, tpu.core_type = #tpu.core_type<tc>, window_params = [{transform_indices = @transform_0, window_bounds = array<i64: 8, 16>}, {pipeline_mode = #tpu.pipeline_mode<synchronous>, transform_indices = @transform_1, window_bounds = array<i64: 17, 32>}, {pipeline_mode = #tpu.pipeline_mode<synchronous>, transform_indices = @transform_2, window_bounds = array<i64: 33, 64>}, {transform_indices = @transform_3, window_bounds = array<i64: 8, 64>}]} {
    %c0 = arith.constant 0 : index
    %c0_0 = arith.constant 0 : index
    %0 = vector.load %arg1[%c0, %c0_0] : memref<8x16xf32, #tpu.memory_space<vmem>>, vector<8x16xf32>
    %c0_1 = arith.constant 0 : index
    %c0_2 = arith.constant 0 : index
    %1 = vector.load %arg2[%c0_1, %c0_2] : memref<17x32xf32, #tpu.memory_space<vmem>>, vector<16x32xf32>
    %c16 = arith.constant 16 : index
    %c0_3 = arith.constant 0 : index
    %2 = vector.load %arg2[%c16, %c0_3] : memref<17x32xf32, #tpu.memory_space<vmem>>, vector<1x32xf32>
    %cst = arith.constant dense<0.000000e+00> : vector<8x32xf32>
    %3 = tpu.matmul %0, %1, %cst {dimension_numbers = #tpu.dot_dimension_numbers<[1], [0], [0], [1], [0, 0, 1, 1], [], []>} : vector<8x16xf32>, vector<16x32xf32>, vector<8x32xf32> -> vector<8x32xf32>
    %4 = vector.broadcast %2 : vector<1x32xf32> to vector<8x32xf32>
    %5 = arith.addf %3, %4 : vector<8x32xf32>
    %cst_4 = arith.constant 0.000000e+00 : f32
    %6 = vector.broadcast %cst_4 : f32 to vector<8x32xf32>
    %7 = arith.maximumf %5, %6 : vector<8x32xf32>
    %c0_5 = arith.constant 0 : index
    %c0_6 = arith.constant 0 : index
    %8 = vector.load %arg3[%c0_5, %c0_6] : memref<33x64xf32, #tpu.memory_space<vmem>>, vector<32x64xf32>
    %c32 = arith.constant 32 : index
    %c0_7 = arith.constant 0 : index
    %9 = vector.load %arg3[%c32, %c0_7] : memref<33x64xf32, #tpu.memory_space<vmem>>, vector<1x64xf32>
    %cst_8 = arith.constant dense<0.000000e+00> : vector<8x64xf32>
    %10 = tpu.matmul %7, %8, %cst_8 {dimension_numbers = #tpu.dot_dimension_numbers<[1], [0], [0], [1], [0, 0, 1, 1], [], []>} : vector<8x32xf32>, vector<32x64xf32>, vector<8x64xf32> -> vector<8x64xf32>
    %11 = vector.broadcast %9 : vector<1x64xf32> to vector<8x64xf32>
    %12 = arith.addf %10, %11 : vector<8x64xf32>
    %13 = math.tanh %12 : vector<8x64xf32>
    %c0_9 = arith.constant 0 : index
    %c0_10 = arith.constant 0 : index
    %14 = vector.load %arg4[%c0_9, %c0_10] : memref<8x64xf32, #tpu.memory_space<vmem>>, vector<8x64xf32>
    tpu.vector_store %arg4[%c0_9, %c0_10], %13 {strides = array<i32>} : memref<8x64xf32, #tpu.memory_space<vmem>>, vector<8x64xf32>,
    return
  }
  func.func @transform_0(%arg0: i32) -> (i32, i32) {
    %c0_i32 = arith.constant 0 : i32
    %c0_i32_0 = arith.constant 0 : i32
    return %arg0, %c0_i32 : i32, i32
  }
  func.func @transform_1(%arg0: i32) -> (i32, i32) {
    %c0_i32 = arith.constant 0 : i32
    %c0_i32_0 = arith.constant 0 : i32
    %c0_i32_1 = arith.constant 0 : i32
    return %c0_i32, %c0_i32_0 : i32, i32
  }
  func.func @transform_2(%arg0: i32) -> (i32, i32) {
    %c0_i32 = arith.constant 0 : i32
    %c0_i32_0 = arith.constant 0 : i32
    %c0_i32_1 = arith.constant 0 : i32
    return %c0_i32, %c0_i32_0 : i32, i32
  }
  func.func @transform_3(%arg0: i32) -> (i32, i32) {
    %c0_i32 = arith.constant 0 : i32
    %c0_i32_0 = arith.constant 0 : i32
    return %arg0, %c0_i32 : i32, i32
  }
}

</mosaic_0001>

<bundles_post_ra>
// kernel: tpu_custom_call.1
= control target key start
LH: loop header
LB: loop body
LE: loop exit
PB: predicated region body
PF: predicated region fallthrough
CT: control target
= control target key end

     0   :  { %8 = vsyncpa [#allocation3], 0  ;;  %s425_s0 = inlined_call_operand.hbm [shape: f32[2,16], index: 0, kind: input, shape index: {}]   ;;  %s426_s1 = inlined_call_operand.hbm [shape: f32[17,32], index: 1, kind: input, shape index: {}]   ;;  %s427_s2 = inlined_call_operand.hbm [shape: f32[33,64], index: 2, kind: input, shape index: {}]   ;;  %s428_s3 = inlined_call_operand.hbm [shape: f32[2,64], index: 3, kind: output, shape index: {}]  }
   0x1   :  { %9 = vsyncpa [#allocation6], 0 }
   0x2   :  { %10 = vsyncpa [#allocation4], 0 }
   0x3   :  { %15 = vsyncadd [#allocation3], 96  ;;  %s371_s12 = smov [#allocation5]  }
   0x4   :  { %s28_s13 = sshll.u32 %s371_s12, 4  ;;  %s29_s13 = int_to_ptr.vmem [resolvable:$true] %s28_s13 }
   0x5   :  { %s293_s14 = scalar_lea.vmem %s29_s13, 384  ;;  %p298_p1 = scmp.lt.s32.totalorder %s29_s13, %s29_s13 }
   0x6   :  { %p294_p0 = scmp.ne.s32.totalorder %s29_s13, %s293_s14  ;;  %p299_p2 = scmp.lt.s32.totalorder %s293_s14, %s293_s14 }
   0x8   :  { %p300_p3 = por %p299_p2, %p298_p1 }
   0xa   :  { %p301_p4 = pnand %p300_p3, %p294_p0 }
   0xc   :  { %304 = shalt.err (!%p301_p4)
}
   0xd   :  { %s372_s15 = smov 128   ;;  %s373_s16 = smov 8  }
   0xe   :  { %34 = dma.hbm_to_vmem [thread:$0]  %s426_s1, 384, %s29_s13, [#allocation6], %s372_s15, %s372_s15, %s373_s16  }
   0xf   :  { %s374_s19 = smov [#allocation2]  }
  0x10   :  { %s16_s20 = sshll.u32 %s374_s19, 4  ;;  %s17_s20 = int_to_ptr.vmem [resolvable:$true] %s16_s20 }
  0x11   :  { %s313_s21 = scalar_lea.vmem %s17_s20, 32  ;;  %s317_s22 = scalar_lea.vmem %s17_s20, 128 }
  0x12   :  { %p314_p5 = scmp.ne.s32.totalorder %s17_s20, %s313_s21  ;;  %p318_p6 = scmp.lt.s32.totalorder %s17_s20, %s17_s20 }
  0x13   :  { %p319_p7 = scmp.lt.s32.totalorder %s317_s22, %s313_s21 }
  0x15   :  { %p320_p8 = por %p319_p7, %p318_p6 }
  0x17   :  { %p321_p9 = pnand %p320_p8, %p314_p5 }
  0x19   :  { %324 = shalt.err (!%p321_p9)
}
  0x1a   :  { %s375_s23 = smov 32   ;;  %s376_s24 = smov 2  }
  0x1b   :  { %22 = dma.hbm_to_vmem [thread:$0]  %s425_s0, 32, %s17_s20, [#allocation3], %s375_s23, %s375_s23, %s376_s24  }
  0x1c   :  { %s377_s1 = smov [#allocation7]  }
  0x1d   :  { %s40_s27 = sshll.u32 %s377_s1, 4  ;;  %s41_s27 = int_to_ptr.vmem [resolvable:$true] %s40_s27 }
  0x1e   :  { %s333_s28 = scalar_lea.vmem %s41_s27, 640  ;;  %p338_p11 = scmp.lt.s32.totalorder %s41_s27, %s41_s27 }
  0x1f   :  { %p334_p10 = scmp.ne.s32.totalorder %s41_s27, %s333_s28  ;;  %p339_p12 = scmp.lt.s32.totalorder %s333_s28, %s333_s28 }
  0x21   :  { %p340_p13 = por %p339_p12, %p338_p11 }
  0x23   :  { %p341_p0 = pnand %p340_p13, %p334_p10 }
  0x25   :  { %344 = shalt.err (!%p341_p0)
}
  0x26   :  { %46 = dma.hbm_to_vmem [thread:$0]  %s427_s2, 640, %s41_s27, [#allocation6], %s372_s15, %s372_s15, %s373_s16  }
  0x27   :  { %365 = dma.done.wait [#allocation3], 128  }
  0x28   :  { %366 = vsyncadd [#allocation3], 4294967168 }
  0x29   :  { %367 = dma.done.wait [#allocation6], 1024  }
  0x2a   :  { %368 = vsyncadd [#allocation6], 4294966272  ;;  %v378_v0 = vmov 0.0   ;;  %vm379_vm0 = vmmov 0   ;;  %v58_v1 = vld [vmem:[#allocation5 + $0x8] sm:$0xff]  ;;  %v57_v2 = vld [vmem:[#allocation5] sm:$0xff] }
  0x2b   :  { %255 = vmatprep.subr.mxu0 %v378_v0  ;;  %259 = vmatprep.mubr.msk.f32.mxu0 %vm379_vm0, %v378_v0  ;;  %v56_v3 = vld [vmem:[#allocation2] sm:$0xff]  ;;  %vm64_vm1 = vcmask 130048   ;;  %v142_v4 = vld [vmem:[#allocation7 + $0x18] sm:$0xff]  ;;  %v141_v5 = vld [vmem:[#allocation7 + $0x10] sm:$0xff]  ;;  %vm148_vm2 = vcmask 261120   ;;  %vm223_vm3 = vcmask 523264  }
  0x2c   :  { %262 = vmatprep.subr.mxu1 %v378_v0  ;;  %270 = vmatprep.mubr.msk.f32.mxu1 %vm379_vm0, %v378_v0  ;;  %v140_v6 = vld [vmem:[#allocation7 + $0x8] sm:$0xff]  ;;  %v139_v7 = vld [vmem:[#allocation7] sm:$0xff]  ;;  %v243_v8 = vld [vmem:[#allocation5 + $0x10] ss:$0 sm:$0xff] }
  0x2d   :  { %256 = vmatpush3.msra.mxu0 %v58_v1  ;;  %263 = vmatpush3.msra.mxu1 %v142_v4  ;;  %v245_v13 = vld [vmem:[#allocation7 + $0x20] ss:$0 sm:$0xff] }
  0x2e   :  { %257 = vmatprep.subr.mxu0 %v378_v0  ;;  %264 = vmatprep.subr.mxu1 %v378_v0 }
  0x2f   :  { %258 = vmatpush3.msra.mxu0 %v57_v2  ;;  %265 = vmatpush3.msra.mxu1 %v141_v5 }
  0x30   :  { %260 = vmatmul.mubr.msk.f32.vlgmr.msra.gmra.mxu0 %vm64_vm1, %v56_v3  ;;  %266 = vmatprep.subr.mxu1 %v378_v0 }
  0x31   :  { %267 = vmatpush3.msra.mxu1 %v140_v6 }
  0x32   :  { %268 = vmatprep.subr.mxu1 %v378_v0 }
  0x33   :  { %269 = vmatpush3.msra.mxu1 %v139_v7 }
  0xf0   :  { %v134_v9 = vpop.f32.mrf.mxu0 }
  0xf1   :  { %v135_v10 = vadd.f32 %v243_v8, %v134_v9 }
  0xf2   :  { %v261_v11 = vpop.f32.mrf.mxu0 }
  0xf3   :  { %v138_v12 = vmax.f32 %v135_v10, 0.0 }
  0xf5   :  { %271 = vmatmul.mubr.msk.f32.vlgmr.msra.gmra.mxu1 %vm148_vm2, %v138_v12 }
 0x1b5   :  { %v218_v14 = vpop.f32.mrf.mxu1 }
 0x1b6   :  { %v219_v15 = vadd.f32 %v245_v13, %v218_v14 }
 0x1b7   :  { %v272_v16 = vpop.f32.mrf.mxu1 }
 0x1b8   :  { %283 = vtanh.f32 %v219_v15 }
 0x1c5   :  { %v284_v17 = vpop.eup %283 }
 0x1c6   :  { %224 = vst.msk [vmem:[#allocation8] sm:$0xff] %vm223_vm3, %v284_v17 }
 0x1c7   :  { %229 = vsyncadd [#allocation4], 96  ;;  %s380_s0 = smov [#allocation8]  }
 0x1c8   :  { %s230_s2 = sshll.u32 %s380_s0, 4  ;;  %s231_s2 = int_to_ptr.vmem [resolvable:$true] %s230_s2 }
 0x1c9   :  { %s345_s4 = scalar_lea.vmem %s231_s2, 32  ;;  %s349_s5 = scalar_lea.vmem %s231_s2, 128 }
 0x1ca   :  { %p346_p1 = scmp.ne.s32.totalorder %s231_s2, %s345_s4  ;;  %p350_p2 = scmp.lt.s32.totalorder %s231_s2, %s231_s2 }
 0x1cb   :  { %p351_p3 = scmp.lt.s32.totalorder %s349_s5, %s345_s4 }
 0x1cd   :  { %p352_p4 = por %p351_p3, %p350_p2 }
 0x1cf   :  { %p353_p5 = pnand %p352_p4, %p346_p1 }
 0x1d1   :  { %356 = shalt.err (!%p353_p5)
}
 0x1d2   :  { %236 = dma.vmem_to_hbm [thread:$0]  %s231_s2, 32, %s428_s3, [#allocation4], %s375_s23, %s375_s23, %s376_s24  }
 0x1d3   :  { %369 = dma.done.wait [#allocation4], 128  }
 0x1d4   :  { %370 = vsyncadd [#allocation4], 4294967168 }
 0x1d5   :  { %240 = vsyncpa [#allocation3], 1 }
 0x1d6   :  { %241 = vsyncpa [#allocation6], 1 }
 0x1d7   :  { %242 = vsyncpa [#allocation4], 1 }

</bundles_post_ra>
